<compile_context>
chip_gen: v5e
topology: v5e:2x2
jax: 0.10.0
libtpu: 0.0.40
codegen_flags: <defaults>
</compile_context>

<pallas_src>
import jax
import jax.numpy as jnp
import jax.scipy.linalg as jsl
from jax.experimental import pallas as pl
from jax.experimental.pallas import tpu as pltpu


# Max lane-width of one fused-FC output tile.  Multiple of 128 (MXU/lane width,
# v5e-friendly); 1024 * 192 * 2B (bf16) = 384 KiB per buffer -> comfortably
# inside v7x's 64 MiB VMEM with double buffering while large enough (>512) to
# run near the HBM roofline on the streamed weight.  Can be raised per
# generation (up to ~8192 bf16 on v6e/v7x).
TILE_N_MAX = 1024
# Number of "parallel" output chunks: lets megacore (v7x, 2 TCs) split the FC
# stream across cores.  Each chunk redundantly recomputes the tiny recurrence.
N_PARALLEL_CHUNKS = 2


def _round_up(x, m):
    return ((x + m - 1) // m) * m


def _fc_pad_width(p2):
    """Padded fused-FC output width for a true width p2 (static ints)."""
    tile_n = min(TILE_N_MAX, _round_up(p2, 128))
    n_tiles = pl.cdiv(p2, tile_n)
    n_par = N_PARALLEL_CHUNKS if n_tiles >= N_PARALLEL_CHUNKS else 1
    n_tiles = _round_up(n_tiles, n_par)
    return n_tiles * tile_n


def _fc_tiling(p2_padded):
    """(tile_n, n_parallel_chunks, tiles_per_chunk) from the padded width."""
    tile_n = min(TILE_N_MAX, p2_padded)
    n_tiles = p2_padded // tile_n
    n_par = N_PARALLEL_CHUNKS if n_tiles >= N_PARALLEL_CHUNKS else 1
    return tile_n, n_par, n_tiles // n_par


# ----------------------------------------------------------------------------
# Fused kernel: packed 4-stream RNN recurrence + weighted aggregation + tiled
# fused dual FC head.  Grid = (parallel_chunk, fc_tile).
# ----------------------------------------------------------------------------
def flashback_fused_kernel(x_ref, w_ref, wih_ref, whh_ref, b_ref, h0whh_ref,
                           front_ref, fcw_ref, fcb_ref, o_ref,
                           xw_ref, outw_ref):
    # x_ref:     (S*B, 4H) bf16  packed embedded inputs (streams on features)
    # w_ref:     (S, B, 4H) f32  flashback weights, normalizer pre-folded
    # wih_ref:   (4H, 4H) bf16   block-diagonal input->hidden weights
    # whh_ref:   (4H, 4H) f32    block-diagonal hidden->hidden weights
    # b_ref:     (1, 4H)  f32    packed RNN bias
    # h0whh_ref: (B, 4H)  f32    h0 @ Whh, precomputed outside the kernel
    # front_ref: (B, 2H)  bf16   concat [p_u, p_tslot]
    # fcw_ref:   (6H, TILE_N) bf16  streamed fused-FC weight tile
    # fcb_ref:   (1, TILE_N)  f32   fused-FC bias tile
    # o_ref:     (B, TILE_N)  f32   fused logits tile
    # xw_ref:    (S*B, 4H) f32 scratch (hoisted input projection)
    # outw_ref:  (B, 4H)   f32 scratch (weighted, normalized hidden state)
    seq_len = w_ref.shape[0]
    batch = w_ref.shape[1]

    @pl.when(pl.program_id(1) == 0)
    def _recurrence():
        # Hoisted bf16 input projection for ALL timesteps / streams: one MXU
        # matmul off the serial chain, staged through VMEM scratch.
        xw_ref[...] = (jnp.dot(x_ref[...], wih_ref[...],
                               preferred_element_type=jnp.float32)
                       + b_ref[...])
        whh = whh_ref[...]
        # t = 0: h0 @ Whh already computed outside -> one less serial MXU push.
        h = jnp.tanh(xw_ref[0:batch, :] + h0whh_ref[...])
        acc = w_ref[0] * h
        # Short static recurrence, fully unrolled; kept in f32 (bf16 error
        # would compound over S steps; v5e has no bf16 VPU/EUP anyway).
        for t in range(1, seq_len):
            h = jnp.tanh(xw_ref[t * batch:(t + 1) * batch, :]
                         + jnp.dot(h, whh, preferred_element_type=jnp.float32))
            acc = acc + w_ref[t] * h
        # Normalizer (1 / sum_t w_t) is folded into w_ref on the host.
        outw_ref[...] = acc

    # Fused FC tile over [front | out_w] without materializing the 6H concat:
    #   y = front @ W[:2H] + out_w @ W[2H:] + b   (bf16 stream, f32 accum)
    n_front = front_ref.shape[1]
    y = (jnp.dot(front_ref[...], fcw_ref[:n_front, :],
                 preferred_element_type=jnp.float32)
         + jnp.dot(outw_ref[...].astype(fcw_ref.dtype), fcw_ref[n_front:, :],
                   preferred_element_type=jnp.float32)
         + fcb_ref[...])
    o_ref[...] = y


def flashback_fused(x_packed, w_packed, wih_bd, whh_bd, b_packed, h0whh,
                    front, fc_w, fc_b):
    SB, H4 = x_packed.shape
    S, B, _ = w_packed.shape
    H2 = front.shape[1]
    H6, P2p = fc_w.shape
    tile_n, n_par, t_per = _fc_tiling(P2p)

    fc_col = lambda c, t: (0, c * t_per + t)
    const2 = lambda c, t: (0, 0)
    const3 = lambda c, t: (0, 0, 0)

    nbytes = lambda a: int(a.size) * a.dtype.itemsize
    block_bytes = (nbytes(x_packed) + nbytes(w_packed) + nbytes(wih_bd)
                   + nbytes(whh_bd) + nbytes(b_packed) + nbytes(h0whh)
                   + nbytes(front)
                   + H6 * tile_n * fc_w.dtype.itemsize
                   + tile_n * fc_b.dtype.itemsize
                   + B * tile_n * 4)
    scratch_bytes = (SB * H4 + B * H4) * 4
    # Explicit scoped-VMEM budget with headroom, capped well under v7x's
    # 64 MiB physical VMEM (the 128 MiB of v5e/v6e would silently overshoot).
    vmem_limit = int(min(max(2 * (2 * block_bytes + scratch_bytes), 8 << 20),
                         48 << 20))

    cost = pl.CostEstimate(
        flops=2 * B * H6 * P2p + 2 * SB * H4 * H4 + 2 * S * B * H4 * H4,
        transcendentals=S * B * H4,
        bytes_accessed=(nbytes(fc_w) + nbytes(fc_b) + B * P2p * 4
                        + nbytes(x_packed) + nbytes(w_packed) + nbytes(wih_bd)
                        + nbytes(whh_bd) + nbytes(front)))

    return pl.pallas_call(
        flashback_fused_kernel,
        out_shape=jax.ShapeDtypeStruct((B, P2p), jnp.float32),
        grid=(n_par, t_per),
        in_specs=[
            pl.BlockSpec((SB, H4), const2),
            pl.BlockSpec((S, B, H4), const3),
            pl.BlockSpec((H4, H4), const2),
            pl.BlockSpec((H4, H4), const2),
            pl.BlockSpec((1, H4), const2),
            pl.BlockSpec((B, H4), const2),
            pl.BlockSpec((B, H2), const2),
            # Streamed, pipelined fc-weight tiles (the dominant bytes at
            # production poi_count).
            # TODO(synk): on v5e, add pipeline_mode=pl.Buffered(3) here if the
            # fcw DMA is still exposed at production sizes.
            pl.BlockSpec((H6, tile_n), fc_col),
            pl.BlockSpec((1, tile_n), fc_col),
        ],
        out_specs=pl.BlockSpec((B, tile_n), fc_col),
        scratch_shapes=[pltpu.VMEM((SB, H4), jnp.float32),
                        pltpu.VMEM((B, H4), jnp.float32)],
        compiler_params=pltpu.CompilerParams(
            dimension_semantics=("parallel", "arbitrary"),
            vmem_limit_bytes=vmem_limit),
        cost_estimate=cost,
    )(x_packed, w_packed, wih_bd, whh_bd, b_packed, h0whh, front, fc_w, fc_b)


# ----------------------------------------------------------------------------
# Flashback temporal / spatial weighting functions (standard Flashback decays).
# ----------------------------------------------------------------------------
LAMBDA_T = 0.01
LAMBDA_S = 100.0


def f_t(delta_t):
    return ((jnp.cos(delta_t * 2.0 * jnp.pi / 86400.0) + 1.0) / 2.0) * \
        jnp.exp(-(delta_t / 86400.0) * LAMBDA_T)


def f_s(delta_s):
    return jnp.exp(-delta_s * LAMBDA_S)


# ----------------------------------------------------------------------------
# One-time parameter packing (hoisted out of the per-call forward).
# ----------------------------------------------------------------------------
def prepare_params(params):
    H = params["poi_emb"].shape[1]
    P = params["fc1_poi_b"].shape[0]
    p2_pad = _fc_pad_width(2 * P)

    wih_bd = jsl.block_diag(*[params["rnn_wih"][i] for i in range(4)])
    whh_bd = jsl.block_diag(*[params["rnn_whh"][i] for i in range(4)])
    fc_w = jnp.concatenate([params["fc1_poi_wt"],
                            params["fc1_catgLayer_wt"]], axis=1)   # (6H, 2P)
    fc_b = jnp.concatenate([params["fc1_poi_b"], params["fc1_catgLayer_b"]])
    fc_w = jnp.pad(fc_w, ((0, 0), (0, p2_pad - 2 * P)))
    fc_b = jnp.pad(fc_b, (0, p2_pad - 2 * P))

    prepped = dict(params)
    prepped["wih_bd"] = wih_bd.astype(jnp.bfloat16)   # bf16 stream, f32 accum
    prepped["whh_bd"] = whh_bd                        # serial recurrence: f32
    prepped["rnn_b_packed"] = params["rnn_b"].reshape(1, 4 * H)
    prepped["fc_w_packed"] = fc_w.astype(jnp.bfloat16)
    prepped["fc_b_packed"] = fc_b[None, :]
    return prepped


# ----------------------------------------------------------------------------
# Forward pass (embedding gathers / packing glue in plain JAX, everything hot
# fused in one Pallas kernel).
# ----------------------------------------------------------------------------
@jax.jit
def flashback_forward(prepped, h0, x_user, x_tf, x_tb, x_cof, x_cob,
                      x_poi_f, x_poi_b, x_catgLayer_f, x_catgLayer_b,
                      y_tsecond, y_tslot):
    S, B = x_poi_f.shape
    H = prepped["poi_emb"].shape[1]
    P = prepped["fc1_poi_b"].shape[0]

    # Embedding lookups (gather glue).
    p_u = jnp.take(prepped["user_emb"], x_user, axis=0)             # (B, H)
    p_tslot = jnp.take(prepped["timeslot_emb"], y_tslot, axis=0)    # (B, H)
    p_poi_f = jnp.take(prepped["poi_emb"], x_poi_f, axis=0)         # (S, B, H)
    p_poi_b = jnp.take(prepped["poi_emb"], x_poi_b, axis=0)
    p_cl_f = jnp.take(prepped["catgLayer_emb"], x_catgLayer_f, axis=0)
    p_cl_b = jnp.take(prepped["catgLayer_emb"], x_catgLayer_b, axis=0)

    # Flashback weights per timestep (cheap elementwise, plain JAX).
    dist_t_f = y_tsecond[None, :] - x_tf                            # (S, B)
    dist_t_b = x_tb - y_tsecond[None, :]
    dist_s_f = jnp.linalg.norm(x_cof[-1][None, :, :] - x_cof, axis=-1)
    dist_s_b = jnp.linalg.norm(x_cob[-1][None, :, :] - x_cob, axis=-1)
    s_fwd = f_s(dist_s_f) + 1e-10
    s_bwd = f_s(dist_s_b) + 1e-10
    t_fwd = f_t(dist_t_f) + 1e-10
    t_bwd = f_t(dist_t_b) + 1e-10

    # Stream order matches the fc1 concat: poi_f | poi_b | catgLayer_f | catgLayer_b.
    w_seqs = jnp.stack([s_fwd, s_bwd, t_fwd, t_bwd], axis=2)        # (S, B, 4)
    # Fold the normalizer 1/sum_t(w_t) into the weights (no in-kernel divide).
    w_norm = w_seqs / jnp.sum(w_seqs, axis=0)[None]
    w_packed = jnp.broadcast_to(w_norm[..., None],
                                (S, B, 4, H)).reshape(S, B, 4 * H)

    # Pack the 4 independent streams along the feature axis (4H = 128 lanes).
    x_seqs = jnp.stack([p_poi_f, p_poi_b, p_cl_f, p_cl_b], axis=2)  # (S, B, 4, H)
    x_packed = x_seqs.reshape(S * B, 4 * H).astype(jnp.bfloat16)

    # Precompute h0 @ Whh (block-diag -> per-stream h0 @ Whh_k): removes one
    # serial MXU push from the in-kernel dependency chain.
    h0_packed = jnp.tile(h0, (1, 4))                                # (B, 4H)
    h0whh = h0_packed @ prepped["whh_bd"]                           # (B, 4H) f32

    front = jnp.concatenate([p_u, p_tslot], axis=1).astype(jnp.bfloat16)

    y = flashback_fused(x_packed, w_packed, prepped["wih_bd"],
                        prepped["whh_bd"], prepped["rnn_b_packed"], h0whh,
                        front, prepped["fc_w_packed"], prepped["fc_b_packed"])
    return y[:, :P], y[:, P:2 * P]


# ----------------------------------------------------------------------------
# Pure-JAX f32 reference (same semantics, unfused) for a sanity check.
# ----------------------------------------------------------------------------
def flashback_reference(params, h0, x_user, x_tf, x_tb, x_cof, x_cob,
                        x_poi_f, x_poi_b, x_catgLayer_f, x_catgLayer_b,
                        y_tsecond, y_tslot):
    p_u = params["user_emb"][x_user]
    p_tslot = params["timeslot_emb"][y_tslot]
    p_poi_f = params["poi_emb"][x_poi_f]
    p_poi_b = params["poi_emb"][x_poi_b]
    p_cl_f = params["catgLayer_emb"][x_catgLayer_f]
    p_cl_b = params["catgLayer_emb"][x_catgLayer_b]

    dist_t_f = y_tsecond[None, :] - x_tf
    dist_t_b = x_tb - y_tsecond[None, :]
    dist_s_f = jnp.linalg.norm(x_cof[-1][None, :, :] - x_cof, axis=-1)
    dist_s_b = jnp.linalg.norm(x_cob[-1][None, :, :] - x_cob, axis=-1)
    s_fwd = f_s(dist_s_f) + 1e-10
    s_bwd = f_s(dist_s_b) + 1e-10
    t_fwd = f_t(dist_t_f) + 1e-10
    t_bwd = f_t(dist_t_b) + 1e-10

    def run_rnn(x_seq, idx):
        wih, whh, b = (params["rnn_wih"][idx], params["rnn_whh"][idx],
                       params["rnn_b"][idx])
        def step(h, x_t):
            h_new = jnp.tanh(x_t @ wih + h @ whh + b)
            return h_new, h_new
        _, hs = jax.lax.scan(step, h0, x_seq)
        return hs

    outs = []
    for x_seq, w, idx in [(p_poi_f, s_fwd, 0), (p_poi_b, s_bwd, 1),
                          (p_cl_f, t_fwd, 2), (p_cl_b, t_bwd, 3)]:
        hs = run_rnn(x_seq, idx)
        num = jnp.sum(w[..., None] * hs, axis=0)
        den = jnp.sum(w, axis=0)[..., None]
        outs.append(num / den)
    out_all = jnp.concatenate([p_u, p_tslot] + outs, axis=1)
    y_poi = out_all @ params["fc1_poi_wt"] + params["fc1_poi_b"]
    y_cl = out_all @ params["fc1_catgLayer_wt"] + params["fc1_catgLayer_b"]
    return y_poi, y_cl


# ----------------------------------------------------------------------------
# Deterministic parameter init (synthetic weights, no checkpoint load).
# ----------------------------------------------------------------------------
def init_params(key, poi_count, user_count, catgLayer_count, timeslot_count, H):
    ks = jax.random.split(key, 12)
    scale = 0.1
    return {
        "poi_emb": scale * jax.random.normal(ks[0], (poi_count, H), jnp.float32),
        "user_emb": scale * jax.random.normal(ks[1], (user_count, H), jnp.float32),
        "catgLayer_emb": scale * jax.random.normal(ks[2], (catgLayer_count, H), jnp.float32),
        "timeslot_emb": scale * jax.random.normal(ks[3], (timeslot_count, H), jnp.float32),
        # 4 independent RNNs (poi fwd/bwd, catgLayer fwd/bwd), stacked on axis 0.
        "rnn_wih": scale * jax.random.normal(ks[4], (4, H, H), jnp.float32),
        "rnn_whh": scale * jax.random.normal(ks[5], (4, H, H), jnp.float32),
        "rnn_b": scale * jax.random.normal(ks[6], (4, 1, H), jnp.float32),
        # fc1_poi: Linear(6H -> poi_count); fc1_catgLayer: Linear(6H -> poi_count)
        "fc1_poi_wt": scale * jax.random.normal(ks[7], (6 * H, poi_count), jnp.float32),
        "fc1_poi_b": scale * jax.random.normal(ks[8], (poi_count,), jnp.float32),
        "fc1_catgLayer_wt": scale * jax.random.normal(ks[9], (6 * H, poi_count), jnp.float32),
        "fc1_catgLayer_b": scale * jax.random.normal(ks[10], (poi_count,), jnp.float32),
    }


if __name__ == "__main__":
    S, B, H = 8, 8, 32
    poi_count, user_count, catg_count, catgLayer_count, timeslot_count = 64, 16, 10, 6, 48

    key = jax.random.PRNGKey(0)
    k_param, k_in = jax.random.split(key)
    params = init_params(k_param, poi_count, user_count, catgLayer_count,
                         timeslot_count, H)
    prepped = prepare_params(params)     # one-time weight packing

    kin = jax.random.split(k_in, 12)
    h0 = jnp.zeros((B, H), jnp.float32)
    x_user = jax.random.randint(kin[0], (B,), 0, user_count)
    x_poi_f = jax.random.randint(kin[1], (S, B), 0, poi_count)
    x_poi_b = jax.random.randint(kin[2], (S, B), 0, poi_count)
    x_catgLayer_f = jax.random.randint(kin[3], (S, B), 0, catgLayer_count)
    x_catgLayer_b = jax.random.randint(kin[4], (S, B), 0, catgLayer_count)
    y_tslot = jax.random.randint(kin[5], (B,), 0, timeslot_count)
    # times in seconds, coords in (lat, lon)-ish units
    x_tf = jax.random.uniform(kin[6], (S, B), jnp.float32, 0.0, 86400.0)
    x_tb = jax.random.uniform(kin[7], (S, B), jnp.float32, 86400.0, 2 * 86400.0)
    y_tsecond = jax.random.uniform(kin[8], (B,), jnp.float32, 43200.0, 86400.0)
    x_cof = jax.random.uniform(kin[9], (S, B, 2), jnp.float32, 0.0, 1.0)
    x_cob = jax.random.uniform(kin[10], (S, B, 2), jnp.float32, 0.0, 1.0)

    data_args = (h0, x_user, x_tf, x_tb, x_cof, x_cob,
                 x_poi_f, x_poi_b, x_catgLayer_f, x_catgLayer_b,
                 y_tsecond, y_tslot)

    y_pred_poi1, y_pred_catgLayer1 = flashback_forward(prepped, *data_args)
    jax.block_until_ready((y_pred_poi1, y_pred_catgLayer1))

    assert y_pred_poi1.shape == (B, poi_count)
    assert y_pred_catgLayer1.shape == (B, poi_count)

    # Tolerance accounts for the (review-approved) bf16 weight/activation
    # stream on the hoisted projection and the FC head (f32 accumulation).
    ref_poi, ref_cl = flashback_reference(params, *data_args)
    assert jnp.allclose(y_pred_poi1, ref_poi, atol=5e-3, rtol=5e-3)
    assert jnp.allclose(y_pred_catgLayer1, ref_cl, atol=5e-3, rtol=5e-3)

    print("KERNEL_OK")
</pallas_src>

<mosaic_0001>
module attributes {stable_mosaic.version = 11 : i64} {
  func.func @flashback_fused_kernel(%arg0: i32, %arg1: i32, %arg2: memref<64x128xbf16, #tpu.memory_space<vmem>>, %arg3: memref<8x8x128xf32, #tpu.memory_space<vmem>>, %arg4: memref<128x128xbf16, #tpu.memory_space<vmem>>, %arg5: memref<128x128xf32, #tpu.memory_space<vmem>>, %arg6: memref<1x128xf32, #tpu.memory_space<vmem>>, %arg7: memref<8x128xf32, #tpu.memory_space<vmem>>, %arg8: memref<8x64xbf16, #tpu.memory_space<vmem>>, %arg9: memref<192x128xbf16, #tpu.memory_space<vmem>>, %arg10: memref<1x128xf32, #tpu.memory_space<vmem>>, %arg11: memref<8x128xf32, #tpu.memory_space<vmem>>, %arg12: memref<64x128xf32, #tpu.memory_space<vmem>>, %arg13: memref<8x128xf32, #tpu.memory_space<vmem>>) attributes {dimension_semantics = [#tpu.dimension_semantics<parallel>, #tpu.dimension_semantics<arbitrary>], iteration_bounds = array<i64: 1, 1>, scalar_prefetch = 0 : i64, scratch_operands = 2 : i64, tpu.core_type = #tpu.core_type<tc>, window_params = [{pipeline_mode = #tpu.pipeline_mode<synchronous>, transform_indices = @transform_0, window_bounds = array<i64: 64, 128>}, {pipeline_mode = #tpu.pipeline_mode<synchronous>, transform_indices = @transform_1, window_bounds = array<i64: 8, 8, 128>}, {pipeline_mode = #tpu.pipeline_mode<synchronous>, transform_indices = @transform_2, window_bounds = array<i64: 128, 128>}, {pipeline_mode = #tpu.pipeline_mode<synchronous>, transform_indices = @transform_3, window_bounds = array<i64: 128, 128>}, {pipeline_mode = #tpu.pipeline_mode<synchronous>, transform_indices = @transform_4, window_bounds = array<i64: 1, 128>}, {pipeline_mode = #tpu.pipeline_mode<synchronous>, transform_indices = @transform_5, window_bounds = array<i64: 8, 128>}, {pipeline_mode = #tpu.pipeline_mode<synchronous>, transform_indices = @transform_6, window_bounds = array<i64: 8, 64>}, {transform_indices = @transform_7, window_bounds = array<i64: 192, 128>}, {transform_indices = @transform_8, window_bounds = array<i64: 1, 128>}, {transform_indices = @transform_9, window_bounds = array<i64: 8, 128>}]} {
    %c0_i32 = arith.constant 0 : i32
    %0 = arith.cmpi eq, %arg1, %c0_i32 : i32
    %1 = arith.extui %0 : i1 to i32
    %c0_i32_0 = arith.constant 0 : i32
    %2 = arith.cmpi ne, %1, %c0_i32_0 : i32
    scf.if %2 {
      %c0_12 = arith.constant 0 : index
      %c0_13 = arith.constant 0 : index
      %15 = vector.load %arg2[%c0_12, %c0_13] : memref<64x128xbf16, #tpu.memory_space<vmem>>, vector<64x128xbf16>
      %c0_14 = arith.constant 0 : index
      %c0_15 = arith.constant 0 : index
      %16 = vector.load %arg4[%c0_14, %c0_15] : memref<128x128xbf16, #tpu.memory_space<vmem>>, vector<128x128xbf16>
      %cst_16 = arith.constant dense<0.000000e+00> : vector<64x128xf32>
      %17 = tpu.matmul %15, %16, %cst_16 {dimension_numbers = #tpu.dot_dimension_numbers<[1], [0], [0], [1], [0, 0, 1, 1], [], []>} : vector<64x128xbf16>, vector<128x128xbf16>, vector<64x128xf32> -> vector<64x128xf32>
      %c0_17 = arith.constant 0 : index
      %c0_18 = arith.constant 0 : index
      %18 = vector.load %arg6[%c0_17, %c0_18] : memref<1x128xf32, #tpu.memory_space<vmem>>, vector<1x128xf32>
      %19 = vector.broadcast %18 : vector<1x128xf32> to vector<64x128xf32>
      %20 = arith.addf %17, %19 : vector<64x128xf32>
      %c0_19 = arith.constant 0 : index
      %c0_20 = arith.constant 0 : index
      %21 = vector.load %arg12[%c0_19, %c0_20] : memref<64x128xf32, #tpu.memory_space<vmem>>, vector<64x128xf32>
      tpu.vector_store %arg12[%c0_19, %c0_20], %20 {strides = array<i32>} : memref<64x128xf32, #tpu.memory_space<vmem>>, vector<64x128xf32>,
      %c0_21 = arith.constant 0 : index
      %c0_22 = arith.constant 0 : index
      %22 = vector.load %arg5[%c0_21, %c0_22] : memref<128x128xf32, #tpu.memory_space<vmem>>, vector<128x128xf32>
      %c0_23 = arith.constant 0 : index
      %c0_24 = arith.constant 0 : index
      %23 = vector.load %arg12[%c0_23, %c0_24] : memref<64x128xf32, #tpu.memory_space<vmem>>, vector<8x128xf32>
      %c0_25 = arith.constant 0 : index
      %c0_26 = arith.constant 0 : index
      %24 = vector.load %arg7[%c0_25, %c0_26] : memref<8x128xf32, #tpu.memory_space<vmem>>, vector<8x128xf32>
      %25 = arith.addf %23, %24 : vector<8x128xf32>
      %26 = math.tanh %25 : vector<8x128xf32>
      %c0_27 = arith.constant 0 : index
      %c0_28 = arith.constant 0 : index
      %c0_29 = arith.constant 0 : index
      %27 = vector.load %arg3[%c0_27, %c0_28, %c0_29] : memref<8x8x128xf32, #tpu.memory_space<vmem>>, vector<1x8x128xf32>
      %28 = vector.shape_cast %27 : vector<1x8x128xf32> to vector<8x128xf32>
      %29 = arith.mulf %28, %26 : vector<8x128xf32>
      %c8 = arith.constant 8 : index
      %c0_30 = arith.constant 0 : index
      %30 = vector.load %arg12[%c8, %c0_30] : memref<64x128xf32, #tpu.memory_space<vmem>>, vector<8x128xf32>
      %cst_31 = arith.constant dense<0.000000e+00> : vector<8x128xf32>
      %31 = tpu.matmul %26, %22, %cst_31 {dimension_numbers = #tpu.dot_dimension_numbers<[1], [0], [0], [1], [0, 0, 1, 1], [], []>} : vector<8x128xf32>, vector<128x128xf32>, vector<8x128xf32> -> vector<8x128xf32>
      %32 = arith.addf %30, %31 : vector<8x128xf32>
      %33 = math.tanh %32 : vector<8x128xf32>
      %c1 = arith.constant 1 : index
      %c0_32 = arith.constant 0 : index
      %c0_33 = arith.constant 0 : index
      %34 = vector.load %arg3[%c1, %c0_32, %c0_33] : memref<8x8x128xf32, #tpu.memory_space<vmem>>, vector<1x8x128xf32>
      %35 = vector.shape_cast %34 : vector<1x8x128xf32> to vector<8x128xf32>
      %36 = arith.mulf %35, %33 : vector<8x128xf32>
      %37 = arith.addf %29, %36 : vector<8x128xf32>
      %c16 = arith.constant 16 : index
      %c0_34 = arith.constant 0 : index
      %38 = vector.load %arg12[%c16, %c0_34] : memref<64x128xf32, #tpu.memory_space<vmem>>, vector<8x128xf32>
      %cst_35 = arith.constant dense<0.000000e+00> : vector<8x128xf32>
      %39 = tpu.matmul %33, %22, %cst_35 {dimension_numbers = #tpu.dot_dimension_numbers<[1], [0], [0], [1], [0, 0, 1, 1], [], []>} : vector<8x128xf32>, vector<128x128xf32>, vector<8x128xf32> -> vector<8x128xf32>
      %40 = arith.addf %38, %39 : vector<8x128xf32>
      %41 = math.tanh %40 : vector<8x128xf32>
      %c2 = arith.constant 2 : index
      %c0_36 = arith.constant 0 : index
      %c0_37 = arith.constant 0 : index
      %42 = vector.load %arg3[%c2, %c0_36, %c0_37] : memref<8x8x128xf32, #tpu.memory_space<vmem>>, vector<1x8x128xf32>
      %43 = vector.shape_cast %42 : vector<1x8x128xf32> to vector<8x128xf32>
      %44 = arith.mulf %43, %41 : vector<8x128xf32>
      %45 = arith.addf %37, %44 : vector<8x128xf32>
      %c24 = arith.constant 24 : index
      %c0_38 = arith.constant 0 : index
      %46 = vector.load %arg12[%c24, %c0_38] : memref<64x128xf32, #tpu.memory_space<vmem>>, vector<8x128xf32>
      %cst_39 = arith.constant dense<0.000000e+00> : vector<8x128xf32>
      %47 = tpu.matmul %41, %22, %cst_39 {dimension_numbers = #tpu.dot_dimension_numbers<[1], [0], [0], [1], [0, 0, 1, 1], [], []>} : vector<8x128xf32>, vector<128x128xf32>, vector<8x128xf32> -> vector<8x128xf32>
      %48 = arith.addf %46, %47 : vector<8x128xf32>
      %49 = math.tanh %48 : vector<8x128xf32>
      %c3 = arith.constant 3 : index
      %c0_40 = arith.constant 0 : index
      %c0_41 = arith.constant 0 : index
      %50 = vector.load %arg3[%c3, %c0_40, %c0_41] : memref<8x8x128xf32, #tpu.memory_space<vmem>>, vector<1x8x128xf32>
      %51 = vector.shape_cast %50 : vector<1x8x128xf32> to vector<8x128xf32>
      %52 = arith.mulf %51, %49 : vector<8x128xf32>
      %53 = arith.addf %45, %52 : vector<8x128xf32>
      %c32 = arith.constant 32 : index
      %c0_42 = arith.constant 0 : index
      %54 = vector.load %arg12[%c32, %c0_42] : memref<64x128xf32, #tpu.memory_space<vmem>>, vector<8x128xf32>
      %cst_43 = arith.constant dense<0.000000e+00> : vector<8x128xf32>
      %55 = tpu.matmul %49, %22, %cst_43 {dimension_numbers = #tpu.dot_dimension_numbers<[1], [0], [0], [1], [0, 0, 1, 1], [], []>} : vector<8x128xf32>, vector<128x128xf32>, vector<8x128xf32> -> vector<8x128xf32>
      %56 = arith.addf %54, %55 : vector<8x128xf32>
      %57 = math.tanh %56 : vector<8x128xf32>
      %c4 = arith.constant 4 : index
      %c0_44 = arith.constant 0 : index
      %c0_45 = arith.constant 0 : index
      %58 = vector.load %arg3[%c4, %c0_44, %c0_45] : memref<8x8x128xf32, #tpu.memory_space<vmem>>, vector<1x8x128xf32>
      %59 = vector.shape_cast %58 : vector<1x8x128xf32> to vector<8x128xf32>
      %60 = arith.mulf %59, %57 : vector<8x128xf32>
      %61 = arith.addf %53, %60 : vector<8x128xf32>
      %c40 = arith.constant 40 : index
      %c0_46 = arith.constant 0 : index
      %62 = vector.load %arg12[%c40, %c0_46] : memref<64x128xf32, #tpu.memory_space<vmem>>, vector<8x128xf32>
      %cst_47 = arith.constant dense<0.000000e+00> : vector<8x128xf32>
      %63 = tpu.matmul %57, %22, %cst_47 {dimension_numbers = #tpu.dot_dimension_numbers<[1], [0], [0], [1], [0, 0, 1, 1], [], []>} : vector<8x128xf32>, vector<128x128xf32>, vector<8x128xf32> -> vector<8x128xf32>
      %64 = arith.addf %62, %63 : vector<8x128xf32>
      %65 = math.tanh %64 : vector<8x128xf32>
      %c5 = arith.constant 5 : index
      %c0_48 = arith.constant 0 : index
      %c0_49 = arith.constant 0 : index
      %66 = vector.load %arg3[%c5, %c0_48, %c0_49] : memref<8x8x128xf32, #tpu.memory_space<vmem>>, vector<1x8x128xf32>
      %67 = vector.shape_cast %66 : vector<1x8x128xf32> to vector<8x128xf32>
      %68 = arith.mulf %67, %65 : vector<8x128xf32>
      %69 = arith.addf %61, %68 : vector<8x128xf32>
      %c48 = arith.constant 48 : index
      %c0_50 = arith.constant 0 : index
      %70 = vector.load %arg12[%c48, %c0_50] : memref<64x128xf32, #tpu.memory_space<vmem>>, vector<8x128xf32>
      %cst_51 = arith.constant dense<0.000000e+00> : vector<8x128xf32>
      %71 = tpu.matmul %65, %22, %cst_51 {dimension_numbers = #tpu.dot_dimension_numbers<[1], [0], [0], [1], [0, 0, 1, 1], [], []>} : vector<8x128xf32>, vector<128x128xf32>, vector<8x128xf32> -> vector<8x128xf32>
      %72 = arith.addf %70, %71 : vector<8x128xf32>
      %73 = math.tanh %72 : vector<8x128xf32>
      %c6 = arith.constant 6 : index
      %c0_52 = arith.constant 0 : index
      %c0_53 = arith.constant 0 : index
      %74 = vector.load %arg3[%c6, %c0_52, %c0_53] : memref<8x8x128xf32, #tpu.memory_space<vmem>>, vector<1x8x128xf32>
      %75 = vector.shape_cast %74 : vector<1x8x128xf32> to vector<8x128xf32>
      %76 = arith.mulf %75, %73 : vector<8x128xf32>
      %77 = arith.addf %69, %76 : vector<8x128xf32>
      %c56 = arith.constant 56 : index
      %c0_54 = arith.constant 0 : index
      %78 = vector.load %arg12[%c56, %c0_54] : memref<64x128xf32, #tpu.memory_space<vmem>>, vector<8x128xf32>
      %cst_55 = arith.constant dense<0.000000e+00> : vector<8x128xf32>
      %79 = tpu.matmul %73, %22, %cst_55 {dimension_numbers = #tpu.dot_dimension_numbers<[1], [0], [0], [1], [0, 0, 1, 1], [], []>} : vector<8x128xf32>, vector<128x128xf32>, vector<8x128xf32> -> vector<8x128xf32>
      %80 = arith.addf %78, %79 : vector<8x128xf32>
      %81 = math.tanh %80 : vector<8x128xf32>
      %c7 = arith.constant 7 : index
      %c0_56 = arith.constant 0 : index
      %c0_57 = arith.constant 0 : index
      %82 = vector.load %arg3[%c7, %c0_56, %c0_57] : memref<8x8x128xf32, #tpu.memory_space<vmem>>, vector<1x8x128xf32>
      %83 = vector.shape_cast %82 : vector<1x8x128xf32> to vector<8x128xf32>
      %84 = arith.mulf %83, %81 : vector<8x128xf32>
      %85 = arith.addf %77, %84 : vector<8x128xf32>
      %c0_58 = arith.constant 0 : index
      %c0_59 = arith.constant 0 : index
      %86 = vector.load %arg13[%c0_58, %c0_59] : memref<8x128xf32, #tpu.memory_space<vmem>>, vector<8x128xf32>
      tpu.vector_store %arg13[%c0_58, %c0_59], %85 {strides = array<i32>} : memref<8x128xf32, #tpu.memory_space<vmem>>, vector<8x128xf32>,
    } else {
    }
    %c0 = arith.constant 0 : index
    %c0_1 = arith.constant 0 : index
    %3 = vector.load %arg8[%c0, %c0_1] : memref<8x64xbf16, #tpu.memory_space<vmem>>, vector<8x64xbf16>
    %c0_2 = arith.constant 0 : index
    %c0_3 = arith.constant 0 : index
    %4 = vector.load %arg9[%c0_2, %c0_3] : memref<192x128xbf16, #tpu.memory_space<vmem>>, vector<64x128xbf16>
    %cst = arith.constant dense<0.000000e+00> : vector<8x128xf32>
    %5 = tpu.matmul %3, %4, %cst {dimension_numbers = #tpu.dot_dimension_numbers<[1], [0], [0], [1], [0, 0, 1, 1], [], []>} : vector<8x64xbf16>, vector<64x128xbf16>, vector<8x128xf32> -> vector<8x128xf32>
    %c0_4 = arith.constant 0 : index
    %c0_5 = arith.constant 0 : index
    %6 = vector.load %arg13[%c0_4, %c0_5] : memref<8x128xf32, #tpu.memory_space<vmem>>, vector<8x128xf32>
    %7 = arith.truncf %6 : vector<8x128xf32> to vector<8x128xbf16>
    %c64 = arith.constant 64 : index
    %c0_6 = arith.constant 0 : index
    %8 = vector.load %arg9[%c64, %c0_6] : memref<192x128xbf16, #tpu.memory_space<vmem>>, vector<128x128xbf16>
    %cst_7 = arith.constant dense<0.000000e+00> : vector<8x128xf32>
    %9 = tpu.matmul %7, %8, %cst_7 {dimension_numbers = #tpu.dot_dimension_numbers<[1], [0], [0], [1], [0, 0, 1, 1], [], []>} : vector<8x128xbf16>, vector<128x128xbf16>, vector<8x128xf32> -> vector<8x128xf32>
    %10 = arith.addf %5, %9 : vector<8x128xf32>
    %c0_8 = arith.constant 0 : index
    %c0_9 = arith.constant 0 : index
    %11 = vector.load %arg10[%c0_8, %c0_9] : memref<1x128xf32, #tpu.memory_space<vmem>>, vector<1x128xf32>
    %12 = vector.broadcast %11 : vector<1x128xf32> to vector<8x128xf32>
    %13 = arith.addf %10, %12 : vector<8x128xf32>
    %c0_10 = arith.constant 0 : index
    %c0_11 = arith.constant 0 : index
    %14 = vector.load %arg11[%c0_10, %c0_11] : memref<8x128xf32, #tpu.memory_space<vmem>>, vector<8x128xf32>
    tpu.vector_store %arg11[%c0_10, %c0_11], %13 {strides = array<i32>} : memref<8x128xf32, #tpu.memory_space<vmem>>, vector<8x128xf32>,
    return
  }
  func.func @transform_0(%arg0: i32, %arg1: i32) -> (i32, i32) {
    %c0_i32 = arith.constant 0 : i32
    %c0_i32_0 = arith.constant 0 : i32
    %c0_i32_1 = arith.constant 0 : i32
    return %c0_i32, %c0_i32_0 : i32, i32
  }
  func.func @transform_1(%arg0: i32, %arg1: i32) -> (i32, i32, i32) {
    %c0_i32 = arith.constant 0 : i32
    %c0_i32_0 = arith.constant 0 : i32
    %c0_i32_1 = arith.constant 0 : i32
    %c0_i32_2 = arith.constant 0 : i32
    return %c0_i32, %c0_i32_0, %c0_i32_1 : i32, i32, i32
  }
  func.func @transform_2(%arg0: i32, %arg1: i32) -> (i32, i32) {
    %c0_i32 = arith.constant 0 : i32
    %c0_i32_0 = arith.constant 0 : i32
    %c0_i32_1 = arith.constant 0 : i32
    return %c0_i32, %c0_i32_0 : i32, i32
  }
  func.func @transform_3(%arg0: i32, %arg1: i32) -> (i32, i32) {
    %c0_i32 = arith.constant 0 : i32
    %c0_i32_0 = arith.constant 0 : i32
    %c0_i32_1 = arith.constant 0 : i32
    return %c0_i32, %c0_i32_0 : i32, i32
  }
  func.func @transform_4(%arg0: i32, %arg1: i32) -> (i32, i32) {
    %c0_i32 = arith.constant 0 : i32
    %c0_i32_0 = arith.constant 0 : i32
    %c0_i32_1 = arith.constant 0 : i32
    return %c0_i32, %c0_i32_0 : i32, i32
  }
  func.func @transform_5(%arg0: i32, %arg1: i32) -> (i32, i32) {
    %c0_i32 = arith.constant 0 : i32
    %c0_i32_0 = arith.constant 0 : i32
    %c0_i32_1 = arith.constant 0 : i32
    return %c0_i32, %c0_i32_0 : i32, i32
  }
  func.func @transform_6(%arg0: i32, %arg1: i32) -> (i32, i32) {
    %c0_i32 = arith.constant 0 : i32
    %c0_i32_0 = arith.constant 0 : i32
    %c0_i32_1 = arith.constant 0 : i32
    return %c0_i32, %c0_i32_0 : i32, i32
  }
  func.func @transform_7(%arg0: i32, %arg1: i32) -> (i32, i32) {
    %c1_i32 = arith.constant 1 : i32
    %0 = arith.muli %arg0, %c1_i32 : i32
    %1 = arith.addi %0, %arg1 : i32
    %c0_i32 = arith.constant 0 : i32
    %c0_i32_0 = arith.constant 0 : i32
    return %c0_i32, %1 : i32, i32
  }
  func.func @transform_8(%arg0: i32, %arg1: i32) -> (i32, i32) {
    %c1_i32 = arith.constant 1 : i32
    %0 = arith.muli %arg0, %c1_i32 : i32
    %1 = arith.addi %0, %arg1 : i32
    %c0_i32 = arith.constant 0 : i32
    %c0_i32_0 = arith.constant 0 : i32
    return %c0_i32, %1 : i32, i32
  }
  func.func @transform_9(%arg0: i32, %arg1: i32) -> (i32, i32) {
    %c1_i32 = arith.constant 1 : i32
    %0 = arith.muli %arg0, %c1_i32 : i32
    %1 = arith.addi %0, %arg1 : i32
    %c0_i32 = arith.constant 0 : i32
    %c0_i32_0 = arith.constant 0 : i32
    return %c0_i32, %1 : i32, i32
  }
}

</mosaic_0001>

<bundles_post_ra>
// kernel: tile.9
= control target key start
LH: loop header
LB: loop body
LE: loop exit
PB: predicated region body
PF: predicated region fallthrough
CT: control target
= control target key end

     0   :  { %vm124_vm0 = vcmask 1047556   ;;  %s176_s10 = smov 32   ;;  %s177_s11 = smov 64   ;;  %vm126_vm1 = vcmask 261120   ;;  %vm136_vm2 = vcmask 1048320   ;;  %vm146_vm3 = vcmask 785920   ;;  %s201_s0 = inlined_call_operand.vmem [shape: bf16[8,4,32], index: 0, kind: input, shape index: {}]   ;;  %s202_s1 = inlined_call_operand.vmem [shape: bf16[8,128], index: 1, kind: output, shape index: {}]  }
   0x1   :  { %v165_v0 = vld [vmem:[%s201_s0 + $0x8] sm:$0xff]   ;;  %v169_v1 = vld [vmem:[%s201_s0] sm:$0xff]   ;;  %s175_s0 = smov 96   ;;  %vm156_vm4 = vcmask 523520  }
   0x2   :  { %v15_v2 = vunpack.c.h.bf16 %v165_v0  ;;  %v45_v3 = vunpack.c.l.bf16 %v165_v0  ;;  %v75_v4 = vunpack.c.h.bf16 %v169_v1  ;;  %v105_v5 = vunpack.c.l.bf16 %v169_v1 }
   0x4   :  { %18 = vst [vmem:[#allocation1 + $0x34] sm:$0xf0] %v15_v2 }
   0x5   :  { %33 = vst [vmem:[#allocation1 + $0x30] sm:$0xf] %v15_v2 }
   0x6   :  { %48 = vst [vmem:[#allocation1 + $0x24] sm:$0xf0] %v45_v3 }
   0x7   :  { %63 = vst [vmem:[#allocation1 + $0x20] sm:$0xf] %v45_v3 }
   0x8   :  { %78 = vst [vmem:[#allocation1 + $0x14] sm:$0xf0] %v75_v4 }
   0x9   :  { %93 = vst [vmem:[#allocation1 + $0x10] sm:$0xf] %v75_v4 }
   0xa   :  { %108 = vst [vmem:[#allocation1 + $0x4] sm:$0xf0] %v105_v5 }
   0xb   :  { %121 = vst [vmem:[#allocation1] sm:$0xf] %v105_v5 }
   0xe   :  { %v131_v6 = vld [vmem:[#allocation1 + $0x3] ss:$8 sm:$0xf0]   ;;  %v151_v7 = vld [vmem:[#allocation1 + $0x1] ss:$8 sm:$0xf0]  }
   0xf   :  { %v141_v13 = vld [vmem:[#allocation1 + $0x2] ss:$8 sm:$0xf0]   ;;  %v123_v16 = vld [vmem:[#allocation1] ss:$8 sm:$0xf0]  }
  0x12   :  { %v129_v8 = vld [vmem:[#allocation1 + $0x3] ss:$8 sm:$0xf]   ;;  %v149_v10 = vld [vmem:[#allocation1 + $0x1] ss:$8 sm:$0xf]  }
  0x13   :  { %v133_v9 = vsel %vm124_vm0, %v131_v6, %v129_v8  ;;  %v153_v11 = vsel %vm124_vm0, %v151_v7, %v149_v10  ;;  %v139_v12 = vld [vmem:[#allocation1 + $0x2] ss:$8 sm:$0xf]   ;;  %v122_v15 = vld [vmem:[#allocation1] ss:$8 sm:$0xf]  }
  0x14   :  { %134 = vrot.lane.b32.xlu0 %v133_v9, %s175_s0  ;;  %154 = vrot.lane.b32.xlu1 %v153_v11, %s176_s10  ;;  %v143_v14 = vsel %vm124_vm0, %v141_v13, %v139_v12  ;;  %v125_v17 = vsel %vm124_vm0, %v123_v16, %v122_v15 }
  0x15   :  { %127 = vst.msk [vmem:[#allocation0] sm:$0xff] %vm126_vm1, %v125_v17  }
  0x1c   :  { %144 = vrot.lane.b32.xlu0 %v143_v14, %s177_s11 }
  0x86   :  { %v135_v18 = vpop.permute.xlu0 %134   ;;  %v155_v19 = vpop.permute.xlu1 %154  }
  0x87   :  { %137 = vst.msk [vmem:[#allocation0] sm:$0xff] %vm136_vm2, %v135_v18  }
  0x8e   :  { %v145_v20 = vpop.permute.xlu0 %144  }
  0x8f   :  { %147 = vst.msk [vmem:[#allocation0] sm:$0xff] %vm146_vm3, %v145_v20  }
  0x90   :  { %157 = vst.msk [vmem:[#allocation0] sm:$0xff] %vm156_vm4, %v155_v19  }
  0x97   :  { %v160_v21 = vld [vmem:[#allocation0] sm:$0xff] }
  0x98   :  { %v161_v22 = vpack.c.bf16 0.0, %v160_v21 }
  0x9a   :  { %164 = vst [vmem:[%s202_s1] sm:$0xf] %v161_v22 }

// kernel: flashback_forward.1
= control target key start
LH: loop header
LB: loop body
LE: loop exit
PB: predicated region body
PF: predicated region fallthrough
CT: control target
= control target key end

     0   :  { %vm540_vm0 = vcmask 523264   ;;  %s1095_s2 = inlined_call_operand.vmem [shape: bf16[128,128], index: 2, kind: input, shape index: {}]   ;;  %s1096_s3 = inlined_call_operand.vmem [shape: f32[128,128], index: 3, kind: input, shape index: {}]   ;;  %s1097_s4 = inlined_call_operand.vmem [shape: f32[1,128], index: 4, kind: input, shape index: {}]   ;;  %s1098_s0 = inlined_call_operand.vmem [shape: bf16[64,128], index: 0, kind: input, shape index: {}]   ;;  %s1099_s5 = inlined_call_operand.vmem [shape: f32[8,128], index: 5, kind: input, shape index: {}]   ;;  %s1100_s1 = inlined_call_operand.vmem [shape: f32[8,8,128], index: 1, kind: input, shape index: {}]   ;;  %s1101_s7 = inlined_call_operand.vmem [shape: bf16[192,128], index: 7, kind: input, shape index: {}]   ;;  %s1102_s6 = inlined_call_operand.vmem [shape: bf16[8,64], index: 6, kind: input, shape index: {}]   ;;  %s1103_s8 = inlined_call_operand.vmem [shape: f32[1,128], index: 8, kind: input, shape index: {}]   ;;  %s1104_s9 = inlined_call_operand.vmem [shape: f32[8,128], index: 9, kind: output, shape index: {}]  }
   0x1   :  { %v710_v0 = vld [vmem:[%s1095_s2 + $0x38] sm:$0xff]  ;;  %v709_v1 = vld [vmem:[%s1095_s2 + $0x30] sm:$0xff]  ;;  %v812_v4 = vld [vmem:[%s1096_s3 + $0x68] sm:$0xff] }
   0x2   :  { %179 = vmatpush.bf16.msra.mxu0 %v710_v0  ;;  %v800_v2 = vld [vmem:[%s1096_s3 + $0x78] sm:$0xff]  ;;  %v805_v3 = vld [vmem:[%s1096_s3 + $0x70] sm:$0xff]  ;;  %v708_v5 = vld [vmem:[%s1095_s2 + $0x28] sm:$0xff] }
   0x3   :  { %239 = vmatpush.msra.mxu3 %v800_v2  ;;  %266 = vmatpush.msra.mxu2 %v800_v2  ;;  %v822_v6 = vld [vmem:[%s1096_s3 + $0x60] sm:$0xff]  ;;  %v830_v7 = vld [vmem:[%s1096_s3 + $0x58] sm:$0xff]  ;;  %v841_v9 = vld [vmem:[%s1096_s3 + $0x50] sm:$0xff] }
   0x4   :  { %320 = vmatpush.msra.mxu1 %v800_v2  ;;  %v707_v8 = vld [vmem:[%s1095_s2 + $0x20] sm:$0xff]  ;;  %v849_v10 = vld [vmem:[%s1096_s3 + $0x48] sm:$0xff]  ;;  %v706_v11 = vld [vmem:[%s1095_s2 + $0x18] sm:$0xff] }
   0x5   :  { %240 = vmatpush.msra.mxu3 %v805_v3  ;;  %267 = vmatpush.msra.mxu2 %v805_v3  ;;  %v860_v12 = vld [vmem:[%s1096_s3 + $0x40] sm:$0xff]  ;;  %v868_v13 = vld [vmem:[%s1096_s3 + $0x38] sm:$0xff]  ;;  %v705_v14 = vld [vmem:[%s1095_s2 + $0x10] sm:$0xff] }
   0x6   :  { %180 = vmatpush.bf16.msra.mxu0 %v709_v1  ;;  %321 = vmatpush.msra.mxu1 %v805_v3  ;;  %v879_v15 = vld [vmem:[%s1096_s3 + $0x30] sm:$0xff]  ;;  %v704_v16 = vld [vmem:[%s1095_s2 + $0x8] sm:$0xff]  ;;  %v703_v17 = vld [vmem:[%s1095_s2] sm:$0xff] }
   0x7   :  { %241 = vmatpush.msra.mxu3 %v812_v4  ;;  %268 = vmatpush.msra.mxu2 %v812_v4  ;;  %v699_v18 = vld [vmem:[%s1098_s0] sm:$0xff]  ;;  %v911_v19 = vld [vmem:[%s1096_s3 + $0x28] sm:$0xff]  ;;  %v927_v21 = vld [vmem:[%s1096_s3 + $0x18] sm:$0xff] }
   0x8   :  { %322 = vmatpush.msra.mxu1 %v812_v4  ;;  %v918_v20 = vld [vmem:[%s1096_s3 + $0x20] sm:$0xff]  ;;  %v936_v22 = vld [vmem:[%s1096_s3 + $0x10] sm:$0xff]  ;;  %v945_v23 = vld [vmem:[%s1096_s3 + $0x8] sm:$0xff] }
   0x9   :  { %242 = vmatpush.msra.mxu3 %v822_v6  ;;  %269 = vmatpush.msra.mxu2 %v822_v6  ;;  %v216_v24 = vld [vmem:[%s1096_s3] sm:$0xff]  ;;  %v700_v31 = vld [vmem:[%s1098_s0 + $0x8] sm:$0xff]  ;;  %v701_v42 = vld [vmem:[%s1098_s0 + $0x10] sm:$0xff] }
   0xa   :  { %181 = vmatpush.bf16.msra.mxu0 %v708_v5  ;;  %323 = vmatpush.msra.mxu1 %v822_v6  ;;  %v976_v25 = vld [vmem:[%s1097_s4] ss:$0 sm:$0xff]  ;;  %v643_v37 = vld [vmem:[%s1100_s1 + $0x8] sm:$0xff]  ;;  %v644_v47 = vld [vmem:[%s1100_s1 + $0x10] sm:$0xff] }
   0xb   :  { %243 = vmatpush.msra.mxu3 %v830_v7  ;;  %270 = vmatpush.msra.mxu2 %v830_v7  ;;  %v233_v27 = vld [vmem:[%s1099_s5] sm:$0xff]  ;;  %v645_v55 = vld [vmem:[%s1100_s1 + $0x18] sm:$0xff] }
   0xc   :  { %324 = vmatpush.msra.mxu1 %v830_v7  ;;  %v236_v36 = vld [vmem:[%s1100_s1] sm:$0xff] }
   0xd   :  { %244 = vmatpush.msra.mxu3 %v841_v9  ;;  %271 = vmatpush.msra.mxu2 %v841_v9  ;;  %v646_v63 = vld [vmem:[%s1100_s1 + $0x20] sm:$0xff] }
   0xe   :  { %182 = vmatpush.bf16.msra.mxu0 %v707_v8  ;;  %325 = vmatpush.msra.mxu1 %v841_v9  ;;  %v647_v8 = vld [vmem:[%s1100_s1 + $0x28] sm:$0xff] }
   0xf   :  { %245 = vmatpush.msra.mxu3 %v849_v10  ;;  %272 = vmatpush.msra.mxu2 %v849_v10 }
  0x10   :  { %326 = vmatpush.msra.mxu1 %v849_v10 }
  0x11   :  { %246 = vmatpush.msra.mxu3 %v860_v12  ;;  %273 = vmatpush.msra.mxu2 %v860_v12 }
  0x12   :  { %183 = vmatpush.bf16.msra.mxu0 %v706_v11  ;;  %327 = vmatpush.msra.mxu1 %v860_v12 }
  0x13   :  { %247 = vmatpush.msra.mxu3 %v868_v13  ;;  %274 = vmatpush.msra.mxu2 %v868_v13 }
  0x14   :  { %328 = vmatpush.msra.mxu1 %v868_v13 }
  0x15   :  { %248 = vmatpush.msra.mxu3 %v879_v15  ;;  %275 = vmatpush.msra.mxu2 %v879_v15 }
  0x16   :  { %184 = vmatpush.bf16.msra.mxu0 %v705_v14  ;;  %329 = vmatpush.msra.mxu1 %v879_v15  ;;  %v721_v14 = vld [vmem:[%s1101_s7 + $0x50] sm:$0xff] }
  0x17   :  { %249 = vmatpush.msra.mxu3 %v911_v19  ;;  %276 = vmatpush.msra.mxu2 %v911_v19 }
  0x18   :  { %330 = vmatpush.msra.mxu1 %v911_v19 }
  0x19   :  { %250 = vmatpush.msra.mxu3 %v918_v20  ;;  %277 = vmatpush.msra.mxu2 %v918_v20 }
  0x1a   :  { %185 = vmatpush.bf16.msra.mxu0 %v704_v16  ;;  %331 = vmatpush.msra.mxu1 %v918_v20  ;;  %v720_v16 = vld [vmem:[%s1101_s7 + $0x48] sm:$0xff] }
  0x1b   :  { %251 = vmatpush.msra.mxu3 %v927_v21  ;;  %278 = vmatpush.msra.mxu2 %v927_v21 }
  0x1c   :  { %332 = vmatpush.msra.mxu1 %v927_v21 }
  0x1d   :  { %252 = vmatpush.msra.mxu3 %v936_v22  ;;  %279 = vmatpush.msra.mxu2 %v936_v22 }
  0x1e   :  { %186 = vmatpush.bf16.msra.mxu0 %v703_v17  ;;  %333 = vmatpush.msra.mxu1 %v936_v22  ;;  %v712_v17 = vld [vmem:[%s1101_s7 + $0x8] sm:$0xff] }
  0x1f   :  { %253 = vmatpush.msra.mxu3 %v945_v23  ;;  %280 = vmatpush.msra.mxu2 %v945_v23 }
  0x20   :  { %334 = vmatpush.msra.mxu1 %v945_v23 }
  0x21   :  { %187 = vmatmul.bf16.vlgmr.msra.gmra.mxu0 %v699_v18  ;;  %254 = vmatpush.msra.mxu3 %v216_v24  ;;  %v719_v18 = vld [vmem:[%s1101_s7 + $0x40] sm:$0xff] }
  0x22   :  { %401 = vmatpush.msrb.mxu0 %v800_v2  ;;  %281 = vmatpush.msra.mxu2 %v216_v24 }
  0x23   :  { %293 = vmatpush.msrb.mxu3 %v800_v2  ;;  %335 = vmatpush.msra.mxu1 %v216_v24 }
  0x24   :  { %402 = vmatpush.msrb.mxu0 %v805_v3  ;;  %347 = vmatpush.msrb.mxu2 %v800_v2 }
  0x25   :  { %294 = vmatpush.msrb.mxu3 %v805_v3 }
  0x26   :  { %403 = vmatpush.msrb.mxu0 %v812_v4  ;;  %348 = vmatpush.msrb.mxu2 %v805_v3 }
  0x27   :  { %295 = vmatpush.msrb.mxu3 %v812_v4 }
  0x28   :  { %404 = vmatpush.msrb.mxu0 %v822_v6  ;;  %349 = vmatpush.msrb.mxu2 %v812_v4 }
  0x29   :  { %296 = vmatpush.msrb.mxu3 %v822_v6 }
  0x2a   :  { %405 = vmatpush.msrb.mxu0 %v830_v7  ;;  %350 = vmatpush.msrb.mxu2 %v822_v6 }
  0x2b   :  { %297 = vmatpush.msrb.mxu3 %v830_v7 }
  0x2c   :  { %406 = vmatpush.msrb.mxu0 %v841_v9  ;;  %351 = vmatpush.msrb.mxu2 %v830_v7 }
  0x2d   :  { %298 = vmatpush.msrb.mxu3 %v841_v9 }
  0x2e   :  { %407 = vmatpush.msrb.mxu0 %v849_v10  ;;  %352 = vmatpush.msrb.mxu2 %v841_v9 }
  0x2f   :  { %299 = vmatpush.msrb.mxu3 %v849_v10 }
  0x30   :  { %408 = vmatpush.msrb.mxu0 %v860_v12  ;;  %353 = vmatpush.msrb.mxu2 %v849_v10 }
  0x31   :  { %300 = vmatpush.msrb.mxu3 %v860_v12  ;;  %192 = vmatmul.bf16.gmra.mxu0 %v700_v31  ;;  %v717_v31 = vld [vmem:[%s1101_s7 + $0x30] sm:$0xff] }
  0x32   :  { %409 = vmatpush.msrb.mxu0 %v868_v13  ;;  %354 = vmatpush.msrb.mxu2 %v860_v12 }
  0x33   :  { %301 = vmatpush.msrb.mxu3 %v868_v13 }
  0x34   :  { %410 = vmatpush.msrb.mxu0 %v879_v15  ;;  %355 = vmatpush.msrb.mxu2 %v868_v13 }
  0x35   :  { %302 = vmatpush.msrb.mxu3 %v879_v15 }
  0x36   :  { %411 = vmatpush.msrb.mxu0 %v911_v19  ;;  %356 = vmatpush.msrb.mxu2 %v879_v15 }
  0x37   :  { %303 = vmatpush.msrb.mxu3 %v911_v19 }
  0x38   :  { %412 = vmatpush.msrb.mxu0 %v918_v20  ;;  %357 = vmatpush.msrb.mxu2 %v911_v19 }
  0x39   :  { %304 = vmatpush.msrb.mxu3 %v918_v20 }
  0x3a   :  { %413 = vmatpush.msrb.mxu0 %v927_v21  ;;  %358 = vmatpush.msrb.mxu2 %v918_v20 }
  0x3b   :  { %305 = vmatpush.msrb.mxu3 %v927_v21 }
  0x3c   :  { %414 = vmatpush.msrb.mxu0 %v936_v22  ;;  %359 = vmatpush.msrb.mxu2 %v927_v21 }
  0x3d   :  { %306 = vmatpush.msrb.mxu3 %v936_v22 }
  0x3e   :  { %415 = vmatpush.msrb.mxu0 %v945_v23  ;;  %360 = vmatpush.msrb.mxu2 %v936_v22 }
  0x3f   :  { %307 = vmatpush.msrb.mxu3 %v945_v23 }
  0x40   :  { %416 = vmatpush.msrb.mxu0 %v216_v24  ;;  %361 = vmatpush.msrb.mxu2 %v945_v23 }
  0x41   :  { %308 = vmatpush.msrb.mxu3 %v216_v24  ;;  %197 = vmatmul.bf16.gmra.mxu0 %v701_v42 }
  0x42   :  { %362 = vmatpush.msrb.mxu2 %v216_v24 }
  0x9e   :  { %v188_v26 = vpop.f32.mrf.mxu0 }
  0x9f   :  { %v189_v28 = vadd.f32 %v976_v25, %v188_v26 }
  0xa1   :  { %v234_v29 = vadd.f32 %v233_v27, %v189_v28 }
  0xa3   :  { %725 = vtanh.f32 %v234_v29  ;;  %v718_v29 = vld [vmem:[%s1101_s7 + $0x38] sm:$0xff] }
  0xa6   :  { %v190_v32 = vpop.f32.mrf.mxu0 }
  0xa7   :  { %v191_v33 = vadd.f32 %v976_v25, %v190_v32  ;;  %v716_v32 = vld [vmem:[%s1101_s7 + $0x28] sm:$0xff] }
  0xa9   :  { %v726_v30 = vpop.eup %725 }
  0xaa   :  { %255 = vmatmul.f32.vlgmr.msra.gmra.mxu3 %v726_v30  ;;  %v237_v39 = vmul.f32 %v726_v30, %v236_v36  ;;  %v428_v30 = vld [vmem:[%s1102_s6] sm:$0xf] }
  0xab   :  { %374 = vmatpush.msra.mxu3 %v800_v2 }
  0xad   :  { %375 = vmatpush.msra.mxu3 %v805_v3  ;;  %v702_v3 = vld [vmem:[%s1098_s0 + $0x18] sm:$0xff] }
  0xae   :  { %v193_v43 = vpop.f32.mrf.mxu0  ;;  %202 = vmatmul.bf16.gmra.mxu0 %v702_v3 }
  0xaf   :  { %376 = vmatpush.msra.mxu3 %v812_v4  ;;  %v194_v44 = vadd.f32 %v976_v25, %v193_v43 }
  0xb1   :  { %377 = vmatpush.msra.mxu3 %v822_v6 }
  0xb3   :  { %378 = vmatpush.msra.mxu3 %v830_v7 }
  0xb5   :  { %379 = vmatpush.msra.mxu3 %v841_v9 }
  0xb6   :  { %v195_v51 = vpop.f32.mrf.mxu0 }
  0xb7   :  { %380 = vmatpush.msra.mxu3 %v849_v10  ;;  %v196_v52 = vadd.f32 %v976_v25, %v195_v51 }
  0xb9   :  { %381 = vmatpush.msra.mxu3 %v860_v12  ;;  %v722_v12 = vld [vmem:[%s1101_s7 + $0x58] sm:$0xff] }
  0xba   :  { %503 = vmatpush.bf16.msrb.mxu1 %v722_v12 }
  0xbb   :  { %382 = vmatpush.msra.mxu3 %v868_v13  ;;  %v714_v13 = vld [vmem:[%s1101_s7 + $0x18] sm:$0xff] }
  0xbd   :  { %383 = vmatpush.msra.mxu3 %v879_v15  ;;  %v713_v15 = vld [vmem:[%s1101_s7 + $0x10] sm:$0xff] }
  0xbe   :  { %v198_v59 = vpop.f32.mrf.mxu0  ;;  %504 = vmatpush.bf16.msrb.mxu1 %v721_v14 }
  0xbf   :  { %384 = vmatpush.msra.mxu3 %v911_v19  ;;  %v199_v60 = vadd.f32 %v976_v25, %v198_v59  ;;  %v711_v19 = vld [vmem:[%s1101_s7] sm:$0xff] }
  0xc1   :  { %385 = vmatpush.msra.mxu3 %v918_v20 }
  0xc2   :  { %505 = vmatpush.bf16.msrb.mxu1 %v720_v16 }
  0xc3   :  { %386 = vmatpush.msra.mxu3 %v927_v21 }
  0xc5   :  { %387 = vmatpush.msra.mxu3 %v936_v22 }
  0xc6   :  { %v200_v4 = vpop.f32.mrf.mxu0  ;;  %506 = vmatpush.bf16.msrb.mxu1 %v719_v18 }
  0xc7   :  { %388 = vmatpush.msra.mxu3 %v945_v23  ;;  %v201_v5 = vadd.f32 %v976_v25, %v200_v4 }
  0xc9   :  { %389 = vmatpush.msra.mxu3 %v216_v24  ;;  %v648_v24 = vld [vmem:[%s1100_s1 + $0x30] sm:$0xff] }
  0xca   :  { %507 = vmatpush.bf16.msrb.mxu1 %v718_v29 }
  0xce   :  { %508 = vmatpush.bf16.msrb.mxu1 %v717_v31 }
  0xd2   :  { %509 = vmatpush.bf16.msrb.mxu1 %v716_v32 }
 0x12b   :  { %v203_v20 = vpop.f32.mrf.mxu0 }
 0x12c   :  { %v204_v21 = vadd.f32 %v976_v25, %v203_v20 }
 0x12d   :  { %v256_v34 = vpop.f32.mrf.mxu3 }
 0x12e   :  { %v259_v35 = vadd.f32 %v256_v34, %v191_v33  ;;  %v715_v33 = vld [vmem:[%s1101_s7 + $0x20] sm:$0xff] }
 0x12f   :  { %510 = vmatpush.bf16.msrb.mxu1 %v715_v33 }
 0x130   :  { %727 = vtanh.f32 %v259_v35 }
 0x133   :  { %v205_v34 = vpop.f32.mrf.mxu0 }
 0x134   :  { %v206_v35 = vadd.f32 %v976_v25, %v205_v34 }
 0x136   :  { %v728_v38 = vpop.eup %727 }
 0x137   :  { %v263_v40 = vmul.f32 %v728_v38, %v643_v37  ;;  %282 = vmatmul.f32.vlgmr.msra.gmra.mxu2 %v728_v38  ;;  %v649_v38 = vld [vmem:[%s1100_s1 + $0x38] sm:$0xff] }
 0x138   :  { %548 = vmatpush.bf16.msra.mxu2 %v714_v13 }
 0x139   :  { %v264_v41 = vadd.f32 %v263_v40, %v237_v39 }
 0x13c   :  { %549 = vmatpush.bf16.msra.mxu2 %v713_v15 }
 0x140   :  { %550 = vmatpush.bf16.msra.mxu2 %v712_v17 }
 0x144   :  { %551 = vmatpush.bf16.msra.mxu2 %v711_v19 }
 0x1ba   :  { %v283_v45 = vpop.f32.mrf.mxu2 }
 0x1bb   :  { %v286_v46 = vadd.f32 %v283_v45, %v194_v44  ;;  %v724_v45 = vld [vmem:[%s1103_s8] ss:$0 sm:$0xff] }
 0x1bd   :  { %729 = vtanh.f32 %v286_v46 }
 0x1c3   :  { %v730_v48 = vpop.eup %729 }
 0x1c4   :  { %v290_v49 = vmul.f32 %v730_v48, %v644_v47  ;;  %309 = vmatmul.f32.vlgmr.msrb.gmra.mxu3 %v730_v48 }
 0x1c6   :  { %v291_v50 = vadd.f32 %v290_v49, %v264_v41 }
 0x247   :  { %v310_v53 = vpop.f32.mrf.mxu3 }
 0x248   :  { %v313_v54 = vadd.f32 %v310_v53, %v196_v52 }
 0x24a   :  { %731 = vtanh.f32 %v313_v54 }
 0x250   :  { %v732_v56 = vpop.eup %731 }
 0x251   :  { %v317_v57 = vmul.f32 %v732_v56, %v645_v55  ;;  %336 = vmatmul.f32.vlgmr.msra.gmra.mxu1 %v732_v56 }
 0x253   :  { %v318_v58 = vadd.f32 %v317_v57, %v291_v50 }
 0x2ce   :  { %v337_v61 = vpop.f32.mrf.mxu1 }
 0x2cf   :  { %v340_v62 = vadd.f32 %v337_v61, %v199_v60 }
 0x2d1   :  { %733 = vtanh.f32 %v340_v62 }
 0x2d7   :  { %v734_v0 = vpop.eup %733 }
 0x2d8   :  { %v344_v1 = vmul.f32 %v734_v0, %v646_v63  ;;  %363 = vmatmul.f32.vlgmr.msrb.gmra.mxu2 %v734_v0 }
 0x2da   :  { %v345_v2 = vadd.f32 %v344_v1, %v318_v58 }
 0x2e0   :  { %698 = vmatmul.msk.bf16.vlgmr.msra.gmra.mxu2 %vm540_vm0, %v428_v30 }
 0x35b   :  { %v364_v6 = vpop.f32.mrf.mxu2 }
 0x35c   :  { %v367_v7 = vadd.f32 %v364_v6, %v201_v5 }
 0x35e   :  { %735 = vtanh.f32 %v367_v7 }
 0x363   :  { %v553_v43 = vpop.f32.mrf.mxu2 }
 0x364   :  { %v736_v9 = vpop.eup %735 }
 0x365   :  { %v371_v10 = vmul.f32 %v736_v9, %v647_v8  ;;  %390 = vmatmul.f32.vlgmr.msra.gmra.mxu3 %v736_v9 }
 0x367   :  { %v372_v11 = vadd.f32 %v371_v10, %v345_v2 }
 0x36b   :  { %v555_v44 = vpop.f32.mrf.mxu2 }
 0x3e8   :  { %v391_v22 = vpop.f32.mrf.mxu3 }
 0x3e9   :  { %v394_v23 = vadd.f32 %v391_v22, %v204_v21 }
 0x3eb   :  { %737 = vtanh.f32 %v394_v23 }
 0x3f1   :  { %v738_v26 = vpop.eup %737 }
 0x3f2   :  { %v398_v27 = vmul.f32 %v738_v26, %v648_v24  ;;  %417 = vmatmul.f32.vlgmr.msrb.gmra.mxu0 %v738_v26 }
 0x3f4   :  { %v399_v28 = vadd.f32 %v398_v27, %v372_v11 }
 0x46f   :  { %v418_v36 = vpop.f32.mrf.mxu0 }
 0x470   :  { %v421_v37 = vadd.f32 %v418_v36, %v206_v35 }
 0x472   :  { %739 = vtanh.f32 %v421_v37 }
 0x478   :  { %v740_v39 = vpop.eup %739 }
 0x479   :  { %v425_v40 = vmul.f32 %v740_v39, %v649_v38 }
 0x47b   :  { %v426_v41 = vadd.f32 %v425_v40, %v399_v28 }
 0x47d   :  { %v438_v42 = vpack.c.bf16 %v426_v41, %v426_v41 }
 0x47f   :  { %511 = vmatmul.bf16.vlgmr.msrb.gmra.mxu1 %v438_v42 }
 0x4fc   :  { %v512_v46 = vpop.f32.mrf.mxu1 }
 0x4fd   :  { %v554_v25 = vadd.f32 %v553_v43, %v512_v46 }
 0x4ff   :  { %v561_v47 = vadd.f32 %v724_v45, %v554_v25 }
 0x501   :  { %562 = vst [vmem:[%s1104_s9] sm:$0xff] %v561_v47 }
 0x504   :  { %v514_v48 = vpop.f32.mrf.mxu1 }

</bundles_post_ra>
